<compile_context>
chip_gen: v6e
topology: v6e:2x2x1
jax: 0.10.0
libtpu: 0.0.40
codegen_flags: <defaults>
</compile_context>

<pallas_src>
import math
import functools

import jax
import jax.numpy as jnp
from jax.experimental import pallas as pl
from jax.experimental.pallas import tpu as pltpu


def _round_up(n, m):
    return ((n + m - 1) // m) * m


def _pad_to(a, shape):
    return jnp.pad(a, [(0, s - d) for d, s in zip(a.shape, shape)])


# -----------------------------------------------------------------------------
# Pallas kernel: full recurrence in one invocation.  All operands are small,
# lane-dense, and fully VMEM-resident; the hidden state is carried through the
# fully-unrolled loop in vregs.
# -----------------------------------------------------------------------------
def _rnac_kernel(x_ref,      # (T*Bp, Ip)     bf16  all timesteps, pre-flattened
                 h0_ref,     # (Bp, Hp)       f32
                 w_in_ref,   # (Ip, Hp+Op)    bf16  [W_rec.T | W_out.T], padded
                 wh_ref,     # (Hp, Hp+Op)    bf16  [Wh_rec.T | Wh_out.T], padded
                 out_ref):   # (Bp, Op)       f32
    Bp, Hp = h0_ref.shape
    Op = out_ref.shape[1]
    T = x_ref.shape[0] // Bp

    # (1) One hoisted, well-filled MXU pass over ALL timesteps and BOTH input
    #     projections: [x_t @ W_rec.T | x_t @ W_out.T].  bf16 operands, f32
    #     accumulation.  Result (T*Bp, Hp+Op) f32 is only ~16 vregs, so it
    #     stays register/VMEM-resident as a value (no scratch round-trip).
    xw_all = jnp.dot(x_ref[...], w_in_ref[...],
                     preferred_element_type=jnp.float32)

    # Output-cell input projection (independent of h): static, aligned slice.
    pre_out_x = xw_all[(T - 1) * Bp:T * Bp, Hp:Hp + Op]          # (Bp, Op)

    # Hidden-path weights: static 128-lane-aligned slices of the VMEM ref,
    # loaded once and reused across the whole unrolled recurrence.
    wh_rec = wh_ref[:, :Hp]                                       # (Hp, Hp)
    wh_out = wh_ref[:, Hp:Hp + Op]                                # (Hp, Op)

    # (2) Serial recurrence h_{t+1} = tanh(XW[t] + h_t @ Wh_rec.T), fully
    #     unrolled at trace time (T is static) so every XW slice is static and
    #     the scheduler sees the whole dependency chain.
    # TODO(synk): if the bundle dump shows the loop-invariant wh_rec RHS being
    # re-pushed to the MXU every step, switch to explicit
    # pltpu.matmul_push_rhs (once, before the loop) + pltpu.matmul_acc_lhs /
    # pltpu.matmul_pop per step to hold the RHS resident in MXU staging.
    h = h0_ref[...]
    for t in range(T - 1):
        pre = xw_all[t * Bp:(t + 1) * Bp, :Hp] + jnp.dot(
            h.astype(jnp.bfloat16), wh_rec,
            preferred_element_type=jnp.float32)
        h = jnp.tanh(pre)

    # (3) Output cell (its x-projection was hoisted into pre_out_x above).
    out_ref[...] = jnp.tanh(
        pre_out_x + jnp.dot(h.astype(jnp.bfloat16), wh_out,
                            preferred_element_type=jnp.float32)
    ).astype(out_ref.dtype)


# -----------------------------------------------------------------------------
# One-time weight preparation (hoisted off the per-call hot path, per review):
# transpose + zero-pad + concatenate + cast to bf16.
# Zero-padding is exact: padded contraction rows contribute 0, padded hidden /
# output lanes stay tanh(0)=0 through the recurrence and are sliced off.
# -----------------------------------------------------------------------------
def prepare_weights(W_rec, Wh_rec, W_out, Wh_out):
    hidden_dim, in_dim = W_rec.shape
    out_dim = W_out.shape[0]
    Ip = _round_up(in_dim, 128)
    Hp = _round_up(hidden_dim, 128)
    Op = _round_up(out_dim, 128)
    w_in = jnp.concatenate(
        [_pad_to(W_rec.T.astype(jnp.float32), (Ip, Hp)),
         _pad_to(W_out.T.astype(jnp.float32), (Ip, Op))], axis=1)
    wh = jnp.concatenate(
        [_pad_to(Wh_rec.T.astype(jnp.float32), (Hp, Hp)),
         _pad_to(Wh_out.T.astype(jnp.float32), (Hp, Op))], axis=1)
    return w_in.astype(jnp.bfloat16), wh.astype(jnp.bfloat16)


# -----------------------------------------------------------------------------
# Hot-path wrapper: only pads/casts x and h0, then runs one kernel.
# -----------------------------------------------------------------------------
@functools.partial(jax.jit, static_argnames=("out_dim",))
def recurrent_nac_forward(x, h0, w_in_p, wh_p, *, out_dim):
    """x: (T, B, in_dim); h0: (B, hidden_dim); returns (B, out_dim) float32."""
    T, B, _ = x.shape
    hidden_dim = h0.shape[1]
    Bp = _round_up(B, 8)              # sublane-aligned batch
    Ip = w_in_p.shape[0]              # lane-aligned contraction dim
    Hp = _round_up(hidden_dim, 128)
    Op = wh_p.shape[1] - Hp

    # Flatten timesteps in the wrapper (where the pad already materializes x)
    # so the kernel never reshapes; bf16 matmul operands, f32 accumulation.
    x_p = _pad_to(x.astype(jnp.float32), (T, Bp, Ip)) \
        .reshape(T * Bp, Ip).astype(jnp.bfloat16)
    h0_p = _pad_to(h0.astype(jnp.float32), (Bp, Hp))

    vmem = pl.BlockSpec(memory_space=pltpu.MemorySpace.VMEM)
    out_p = pl.pallas_call(
        _rnac_kernel,
        out_shape=jax.ShapeDtypeStruct((Bp, Op), jnp.float32),
        in_specs=[vmem] * 4,
        out_specs=vmem,
    )(x_p, h0_p, w_in_p, wh_p)

    # TODO(synk): at larger T/B, switch x to grid=(T,) with a (1, Bp, Ip)
    # BlockSpec (auto double-buffered prefetch, bounded VMEM — switch earlier
    # on v7x's 64 MiB VMEM) and add a batch-parallel leading grid axis with
    # dimension_semantics=("parallel", ...) so v7x's two TensorCores split the
    # batch.  Unnecessary at these toy sizes.
    return out_p[:B, :out_dim]


# -----------------------------------------------------------------------------
# Deterministic parameter construction (mirrors the PyTorch __init__ recipe):
#   W_hat, M_hat ~ kaiming_uniform(a=sqrt(5)) == U(-1/sqrt(fan_in), 1/sqrt(fan_in))
#   W = tanh(W_hat) * sigmoid(M_hat)
# -----------------------------------------------------------------------------
def make_nac_weight(key, out_dim, in_dim):
    k1, k2 = jax.random.split(key)
    bound = 1.0 / math.sqrt(in_dim)
    w_hat = jax.random.uniform(k1, (out_dim, in_dim), jnp.float32, -bound, bound)
    m_hat = jax.random.uniform(k2, (out_dim, in_dim), jnp.float32, -bound, bound)
    return jnp.tanh(w_hat) * jax.nn.sigmoid(m_hat)


def reference_forward(x, h0, W_rec, Wh_rec, W_out, Wh_out):
    """Pure-JAX f32 reference for correctness checking."""
    T = x.shape[0]
    h = h0
    for t in range(T - 1):
        h = jnp.tanh(x[t] @ W_rec.T + h @ Wh_rec.T)
    return jnp.tanh(x[T - 1] @ W_out.T + h @ Wh_out.T)


if __name__ == "__main__":
    num_steps, batch, input_dim = 8, 4, 16
    hidden_dim, output_dim = 32, 8

    key = jax.random.PRNGKey(0)
    kx, kh, k1, k2, k3, k4 = jax.random.split(key, 6)

    # Inputs: x is (num_steps, batch, input_dim)
    x = jax.random.normal(kx, (num_steps, batch, input_dim), jnp.float32)

    # hidden0 ~ U(0, 1), shared across batch (matches hidden0.uniform_(0, 1))
    h0_vec = jax.random.uniform(kh, (hidden_dim,), jnp.float32, 0.0, 1.0)
    h0 = jnp.broadcast_to(h0_vec, (batch, hidden_dim))

    # Recurrent cell: in_dim -> hidden_dim, hidden transform hidden_dim -> hidden_dim
    W_rec  = make_nac_weight(k1, hidden_dim, input_dim)
    Wh_rec = make_nac_weight(k2, hidden_dim, hidden_dim)
    # Output cell: in_dim -> output_dim, hidden transform hidden_dim -> output_dim
    W_out  = make_nac_weight(k3, output_dim, input_dim)
    Wh_out = make_nac_weight(k4, output_dim, hidden_dim)

    # One-time weight prep (off the per-call hot path).
    w_in_p, wh_p = prepare_weights(W_rec, Wh_rec, W_out, Wh_out)

    out = recurrent_nac_forward(x, h0, w_in_p, wh_p, out_dim=output_dim)
    out = jax.block_until_ready(out)

    ref = reference_forward(x, h0, W_rec, Wh_rec, W_out, Wh_out)
    assert out.shape == (batch, output_dim)
    # Kernel uses bf16 MXU operands with f32 accumulation (per the perf review),
    # so the previous 1e-5 tolerance is loosened per the review's correctness
    # caveat; observed error is dominated by bf16 operand rounding (~1e-2).
    assert jnp.allclose(out, ref, atol=5e-2, rtol=5e-2), "mismatch vs reference"

    print("KERNEL_OK")
</pallas_src>

<mosaic_0001>
module attributes {stable_mosaic.version = 11 : i64} {
  func.func @_rnac_kernel(%arg0: memref<64x128xbf16, #tpu.memory_space<vmem>>, %arg1: memref<8x128xf32, #tpu.memory_space<vmem>>, %arg2: memref<128x256xbf16, #tpu.memory_space<vmem>>, %arg3: memref<128x256xbf16, #tpu.memory_space<vmem>>, %arg4: memref<8x128xf32, #tpu.memory_space<vmem>>) attributes {dimension_semantics = [], scalar_prefetch = 0 : i64, scratch_operands = 0 : i64, tpu.core_type = #tpu.core_type<tc>} {
    %c0 = arith.constant 0 : index
    %c0_0 = arith.constant 0 : index
    %0 = vector.load %arg0[%c0, %c0_0] : memref<64x128xbf16, #tpu.memory_space<vmem>>, vector<64x128xbf16>
    %c0_1 = arith.constant 0 : index
    %c0_2 = arith.constant 0 : index
    %1 = vector.load %arg2[%c0_1, %c0_2] : memref<128x256xbf16, #tpu.memory_space<vmem>>, vector<128x256xbf16>
    %cst = arith.constant dense<0.000000e+00> : vector<64x256xf32>
    %2 = tpu.matmul %0, %1, %cst {dimension_numbers = #tpu.dot_dimension_numbers<[1], [0], [0], [1], [0, 0, 1, 1], [], []>} : vector<64x128xbf16>, vector<128x256xbf16>, vector<64x256xf32> -> vector<64x256xf32>
    %3 = vector.extract_strided_slice %2 {offsets = [56, 128], sizes = [8, 128], strides = [1, 1]} : vector<64x256xf32> to vector<8x128xf32>
    %c0_3 = arith.constant 0 : index
    %c0_4 = arith.constant 0 : index
    %4 = vector.load %arg3[%c0_3, %c0_4] : memref<128x256xbf16, #tpu.memory_space<vmem>>, vector<128x128xbf16>
    %c0_5 = arith.constant 0 : index
    %c128 = arith.constant 128 : index
    %5 = vector.load %arg3[%c0_5, %c128] : memref<128x256xbf16, #tpu.memory_space<vmem>>, vector<128x128xbf16>
    %c0_6 = arith.constant 0 : index
    %c0_7 = arith.constant 0 : index
    %6 = vector.load %arg1[%c0_6, %c0_7] : memref<8x128xf32, #tpu.memory_space<vmem>>, vector<8x128xf32>
    %7 = vector.extract_strided_slice %2 {offsets = [0, 0], sizes = [8, 128], strides = [1, 1]} : vector<64x256xf32> to vector<8x128xf32>
    %8 = arith.truncf %6 : vector<8x128xf32> to vector<8x128xbf16>
    %cst_8 = arith.constant dense<0.000000e+00> : vector<8x128xf32>
    %9 = tpu.matmul %8, %4, %cst_8 {dimension_numbers = #tpu.dot_dimension_numbers<[1], [0], [0], [1], [0, 0, 1, 1], [], []>} : vector<8x128xbf16>, vector<128x128xbf16>, vector<8x128xf32> -> vector<8x128xf32>
    %10 = arith.addf %7, %9 : vector<8x128xf32>
    %11 = math.tanh %10 : vector<8x128xf32>
    %12 = vector.extract_strided_slice %2 {offsets = [8, 0], sizes = [8, 128], strides = [1, 1]} : vector<64x256xf32> to vector<8x128xf32>
    %13 = arith.truncf %11 : vector<8x128xf32> to vector<8x128xbf16>
    %cst_9 = arith.constant dense<0.000000e+00> : vector<8x128xf32>
    %14 = tpu.matmul %13, %4, %cst_9 {dimension_numbers = #tpu.dot_dimension_numbers<[1], [0], [0], [1], [0, 0, 1, 1], [], []>} : vector<8x128xbf16>, vector<128x128xbf16>, vector<8x128xf32> -> vector<8x128xf32>
    %15 = arith.addf %12, %14 : vector<8x128xf32>
    %16 = math.tanh %15 : vector<8x128xf32>
    %17 = vector.extract_strided_slice %2 {offsets = [16, 0], sizes = [8, 128], strides = [1, 1]} : vector<64x256xf32> to vector<8x128xf32>
    %18 = arith.truncf %16 : vector<8x128xf32> to vector<8x128xbf16>
    %cst_10 = arith.constant dense<0.000000e+00> : vector<8x128xf32>
    %19 = tpu.matmul %18, %4, %cst_10 {dimension_numbers = #tpu.dot_dimension_numbers<[1], [0], [0], [1], [0, 0, 1, 1], [], []>} : vector<8x128xbf16>, vector<128x128xbf16>, vector<8x128xf32> -> vector<8x128xf32>
    %20 = arith.addf %17, %19 : vector<8x128xf32>
    %21 = math.tanh %20 : vector<8x128xf32>
    %22 = vector.extract_strided_slice %2 {offsets = [24, 0], sizes = [8, 128], strides = [1, 1]} : vector<64x256xf32> to vector<8x128xf32>
    %23 = arith.truncf %21 : vector<8x128xf32> to vector<8x128xbf16>
    %cst_11 = arith.constant dense<0.000000e+00> : vector<8x128xf32>
    %24 = tpu.matmul %23, %4, %cst_11 {dimension_numbers = #tpu.dot_dimension_numbers<[1], [0], [0], [1], [0, 0, 1, 1], [], []>} : vector<8x128xbf16>, vector<128x128xbf16>, vector<8x128xf32> -> vector<8x128xf32>
    %25 = arith.addf %22, %24 : vector<8x128xf32>
    %26 = math.tanh %25 : vector<8x128xf32>
    %27 = vector.extract_strided_slice %2 {offsets = [32, 0], sizes = [8, 128], strides = [1, 1]} : vector<64x256xf32> to vector<8x128xf32>
    %28 = arith.truncf %26 : vector<8x128xf32> to vector<8x128xbf16>
    %cst_12 = arith.constant dense<0.000000e+00> : vector<8x128xf32>
    %29 = tpu.matmul %28, %4, %cst_12 {dimension_numbers = #tpu.dot_dimension_numbers<[1], [0], [0], [1], [0, 0, 1, 1], [], []>} : vector<8x128xbf16>, vector<128x128xbf16>, vector<8x128xf32> -> vector<8x128xf32>
    %30 = arith.addf %27, %29 : vector<8x128xf32>
    %31 = math.tanh %30 : vector<8x128xf32>
    %32 = vector.extract_strided_slice %2 {offsets = [40, 0], sizes = [8, 128], strides = [1, 1]} : vector<64x256xf32> to vector<8x128xf32>
    %33 = arith.truncf %31 : vector<8x128xf32> to vector<8x128xbf16>
    %cst_13 = arith.constant dense<0.000000e+00> : vector<8x128xf32>
    %34 = tpu.matmul %33, %4, %cst_13 {dimension_numbers = #tpu.dot_dimension_numbers<[1], [0], [0], [1], [0, 0, 1, 1], [], []>} : vector<8x128xbf16>, vector<128x128xbf16>, vector<8x128xf32> -> vector<8x128xf32>
    %35 = arith.addf %32, %34 : vector<8x128xf32>
    %36 = math.tanh %35 : vector<8x128xf32>
    %37 = vector.extract_strided_slice %2 {offsets = [48, 0], sizes = [8, 128], strides = [1, 1]} : vector<64x256xf32> to vector<8x128xf32>
    %38 = arith.truncf %36 : vector<8x128xf32> to vector<8x128xbf16>
    %cst_14 = arith.constant dense<0.000000e+00> : vector<8x128xf32>
    %39 = tpu.matmul %38, %4, %cst_14 {dimension_numbers = #tpu.dot_dimension_numbers<[1], [0], [0], [1], [0, 0, 1, 1], [], []>} : vector<8x128xbf16>, vector<128x128xbf16>, vector<8x128xf32> -> vector<8x128xf32>
    %40 = arith.addf %37, %39 : vector<8x128xf32>
    %41 = math.tanh %40 : vector<8x128xf32>
    %42 = arith.truncf %41 : vector<8x128xf32> to vector<8x128xbf16>
    %cst_15 = arith.constant dense<0.000000e+00> : vector<8x128xf32>
    %43 = tpu.matmul %42, %5, %cst_15 {dimension_numbers = #tpu.dot_dimension_numbers<[1], [0], [0], [1], [0, 0, 1, 1], [], []>} : vector<8x128xbf16>, vector<128x128xbf16>, vector<8x128xf32> -> vector<8x128xf32>
    %44 = arith.addf %3, %43 : vector<8x128xf32>
    %45 = math.tanh %44 : vector<8x128xf32>
    %c0_16 = arith.constant 0 : index
    %c0_17 = arith.constant 0 : index
    %46 = vector.load %arg4[%c0_16, %c0_17] : memref<8x128xf32, #tpu.memory_space<vmem>>, vector<8x128xf32>
    tpu.vector_store %arg4[%c0_16, %c0_17], %45 {strides = array<i32>} : memref<8x128xf32, #tpu.memory_space<vmem>>, vector<8x128xf32>,
    return
  }
}

</mosaic_0001>

<bundles_post_ra>
// kernel: recurrent_nac_forward.1
= control target key start
LH: loop header
LB: loop body
LE: loop exit
PB: predicated region body
PF: predicated region fallthrough
CT: control target
= control target key end

     0   :  { %9 = vsyncpa [#allocation3], 0  ;;  %s1325_s0 = inlined_call_operand.vmem [shape: bf16[64,128], index: 0, kind: input, shape index: {}]   ;;  %s1326_s1 = inlined_call_operand.vmem [shape: f32[8,128], index: 1, kind: input, shape index: {}]   ;;  %s1327_s2 = inlined_call_operand.hbm [shape: bf16[128,256], index: 2, kind: input, shape index: {}]   ;;  %s1328_s3 = inlined_call_operand.hbm [shape: bf16[128,256], index: 3, kind: input, shape index: {}]   ;;  %s1329_s4 = inlined_call_operand.vmem [shape: f32[8,128], index: 4, kind: output, shape index: {}]  }
   0x1   :  { %10 = vsyncpa [#allocation5], 0  ;;  %s1098_s15 = smov [#allocation2]  }
   0x2   :  { %s20_s16 = sshll.u32 %s1098_s15, 4  ;;  %s21_s16 = int_to_ptr.vmem [resolvable:$true] %s20_s16 }
   0x3   :  { %s1062_s17 = scalar_lea.vmem %s21_s16, 2048  ;;  %p1067_p1 = scmp.lt.s32.totalorder %s21_s16, %s21_s16 }
   0x4   :  { %p1063_p0 = scmp.ne.s32.totalorder %s21_s16, %s1062_s17  ;;  %p1068_p2 = scmp.lt.s32.totalorder %s1062_s17, %s1062_s17 }
   0x6   :  { %p1069_p3 = por %p1068_p2, %p1067_p1 }
   0x8   :  { %p1070_p4 = pnand %p1069_p3, %p1063_p0 }
   0xa   :  { %1073 = shalt.err (!%p1070_p4)
}
   0xb   :  { %s1099_s18 = smov 128   ;;  %s1100_s19 = smov 8  }
   0xc   :  { %26 = dma.hbm_to_vmem [thread:$0]  %s1327_s2, 2048, %s21_s16, [#allocation3], %s1099_s18, %s1099_s18, %s1100_s19  }
   0xd   :  { %s1101_s22 = smov [#allocation4]  }
   0xe   :  { %s32_s23 = sshll.u32 %s1101_s22, 4  ;;  %s33_s23 = int_to_ptr.vmem [resolvable:$true] %s32_s23 }
   0xf   :  { %s1082_s24 = scalar_lea.vmem %s33_s23, 2048  ;;  %p1087_p6 = scmp.lt.s32.totalorder %s33_s23, %s33_s23 }
  0x10   :  { %p1083_p5 = scmp.ne.s32.totalorder %s33_s23, %s1082_s24  ;;  %p1088_p7 = scmp.lt.s32.totalorder %s1082_s24, %s1082_s24 }
  0x12   :  { %p1089_p8 = por %p1088_p7, %p1087_p6 }
  0x14   :  { %p1090_p9 = pnand %p1089_p8, %p1083_p5 }
  0x16   :  { %1093 = shalt.err (!%p1090_p9)
}
  0x17   :  { %38 = dma.hbm_to_vmem [thread:$0]  %s1328_s3, 2048, %s33_s23, [#allocation5], %s1099_s18, %s1099_s18, %s1100_s19  }
  0x18   :  { %1094 = dma.done.wait [#allocation3], 2048  }
  0x19   :  { %1095 = vsyncadd [#allocation3], 4294965248 }
  0x1a   :  { %1096 = dma.done.wait [#allocation5], 2048  }
  0x1b   :  { %1097 = vsyncadd [#allocation5], 4294965248  ;;  %v1102_v0 = vmov 0.0   ;;  %vm1103_vm0 = vmmov 0   ;;  %v1104_v1 = vmov 0   ;;  %v271_v25 = vld [vmem:[%s1326_s1] sm:$0xff] }
  0x1c   :  { %827 = vmatprep.subr.bf16.mxu1 %v1102_v0  ;;  %843 = vmatprep.mubr.msk.bf16.mxu1 %vm1103_vm0, %v1102_v0  ;;  %v994_v2 = vld [vmem:[#allocation2 + $0x74] ss:$8 sps:$4 sm:$0xff]   ;;  %v1140_v3 = vld [vmem:[#allocation4 + $0x70] ss:$8 sps:$4 sm:$0xff]   ;;  %v998_v5 = vld [vmem:[#allocation2 + $0x64] ss:$8 sps:$4 sm:$0xff]   ;;  %v272_v27 = vpack.c.bf16 %v271_v25, %v271_v25 }
  0x1d   :  { %206 = vmatprep.mubr.bf16.mxu0 %v1104_v1  ;;  %174 = vmatprep.subr.bf16.mxu0 %v994_v2  ;;  %v997_v4 = vld [vmem:[#allocation2 + $0x70] ss:$8 sps:$4 sm:$0xff]   ;;  %v1144_v6 = vld [vmem:[#allocation4 + $0x60] ss:$8 sps:$4 sm:$0xff]   ;;  %v1002_v8 = vld [vmem:[#allocation2 + $0x54] ss:$8 sps:$4 sm:$0xff]  }
  0x1e   :  { %828 = vmatpush3.bf16.msra.mxu1 %v1140_v3  ;;  %175 = vmatpush1.bf16.msra.mxu0 %v997_v4  ;;  %v1001_v7 = vld [vmem:[#allocation2 + $0x60] ss:$8 sps:$4 sm:$0xff]   ;;  %v1147_v9 = vld [vmem:[#allocation4 + $0x50] ss:$8 sps:$4 sm:$0xff]   ;;  %v1006_v11 = vld [vmem:[#allocation2 + $0x44] ss:$8 sps:$4 sm:$0xff]  }
  0x1f   :  { %829 = vmatprep.subr.bf16.mxu1 %v1102_v0  ;;  %176 = vmatprep.subr.bf16.mxu0 %v998_v5  ;;  %v1005_v10 = vld [vmem:[#allocation2 + $0x50] ss:$8 sps:$4 sm:$0xff]   ;;  %v1151_v12 = vld [vmem:[#allocation4 + $0x40] ss:$8 sps:$4 sm:$0xff]   ;;  %v1010_v14 = vld [vmem:[#allocation2 + $0x34] ss:$8 sps:$4 sm:$0xff]  }
  0x20   :  { %v1009_v13 = vld [vmem:[#allocation2 + $0x40] ss:$8 sps:$4 sm:$0xff]   ;;  %v1155_v15 = vld [vmem:[#allocation4 + $0x30] ss:$8 sps:$4 sm:$0xff]   ;;  %v1014_v17 = vld [vmem:[#allocation2 + $0x24] ss:$8 sps:$4 sm:$0xff]  }
  0x21   :  { %v1013_v16 = vld [vmem:[#allocation2 + $0x30] ss:$8 sps:$4 sm:$0xff]   ;;  %v1158_v18 = vld [vmem:[#allocation4 + $0x20] ss:$8 sps:$4 sm:$0xff]   ;;  %v1018_v20 = vld [vmem:[#allocation2 + $0x14] ss:$8 sps:$4 sm:$0xff]  }
  0x22   :  { %830 = vmatpush3.bf16.msra.mxu1 %v1144_v6  ;;  %177 = vmatpush1.bf16.msra.mxu0 %v1001_v7  ;;  %v1017_v19 = vld [vmem:[#allocation2 + $0x20] ss:$8 sps:$4 sm:$0xff]   ;;  %v1162_v21 = vld [vmem:[#allocation4 + $0x10] ss:$8 sps:$4 sm:$0xff]   ;;  %v1022_v23 = vld [vmem:[#allocation2 + $0x4] ss:$8 sps:$4 sm:$0xff]  }
  0x23   :  { %831 = vmatprep.subr.bf16.mxu1 %v1102_v0  ;;  %178 = vmatprep.subr.bf16.mxu0 %v1002_v8  ;;  %v1021_v22 = vld [vmem:[#allocation2 + $0x10] ss:$8 sps:$4 sm:$0xff]   ;;  %v1166_v24 = vld [vmem:[#allocation4] ss:$8 sps:$4 sm:$0xff]  }
  0x24   :  { %v1025_v26 = vld [vmem:[#allocation2] ss:$8 sps:$4 sm:$0xff]   ;;  %v1028_v30 = vld [vmem:[%s1325_s0 + $0x10] sm:$0xff]   ;;  %v1029_v31 = vld [vmem:[%s1325_s0 + $0x18] sm:$0xff]  }
  0x25   :  { %v1026_v28 = vld [vmem:[%s1325_s0] sm:$0xff]   ;;  %v1027_v29 = vld [vmem:[%s1325_s0 + $0x8] sm:$0xff]  }
  0x26   :  { %832 = vmatpush3.bf16.msra.mxu1 %v1147_v9  ;;  %179 = vmatpush1.bf16.msra.mxu0 %v1005_v10 }
  0x27   :  { %833 = vmatprep.subr.bf16.mxu1 %v1102_v0  ;;  %180 = vmatprep.subr.bf16.mxu0 %v1006_v11 }
  0x2a   :  { %834 = vmatpush3.bf16.msra.mxu1 %v1151_v12  ;;  %181 = vmatpush1.bf16.msra.mxu0 %v1009_v13 }
  0x2b   :  { %835 = vmatprep.subr.bf16.mxu1 %v1102_v0  ;;  %182 = vmatprep.subr.bf16.mxu0 %v1010_v14 }
  0x2e   :  { %836 = vmatpush3.bf16.msra.mxu1 %v1155_v15  ;;  %183 = vmatpush1.bf16.msra.mxu0 %v1013_v16 }
  0x2f   :  { %837 = vmatprep.subr.bf16.mxu1 %v1102_v0  ;;  %184 = vmatprep.subr.bf16.mxu0 %v1014_v17 }
  0x32   :  { %838 = vmatpush3.bf16.msra.mxu1 %v1158_v18  ;;  %185 = vmatpush1.bf16.msra.mxu0 %v1017_v19 }
  0x33   :  { %839 = vmatprep.subr.bf16.mxu1 %v1102_v0  ;;  %186 = vmatprep.subr.bf16.mxu0 %v1018_v20 }
  0x36   :  { %840 = vmatpush3.bf16.msra.mxu1 %v1162_v21  ;;  %187 = vmatpush1.bf16.msra.mxu0 %v1021_v22  ;;  %v1032_v22 = vld [vmem:[#allocation4 + $0x54] ss:$8 sps:$4 sm:$0xff]  }
  0x37   :  { %841 = vmatprep.subr.bf16.mxu1 %v1102_v0  ;;  %188 = vmatprep.subr.bf16.mxu0 %v1022_v23 }
  0x3a   :  { %842 = vmatpush3.bf16.msra.mxu1 %v1166_v24  ;;  %189 = vmatpush1.bf16.msra.mxu0 %v1025_v26 }
  0x3b   :  { %867 = vmatprep.subr.bf16.mxu1 %v1102_v0  ;;  %847 = vmatprep.subr.bf16.mxu0 %v1102_v0 }
  0x3d   :  { %844 = vmatmul.mubr.bf16.vlgmr.msra.gmra.mxu1 %v272_v27  ;;  %207 = vmatmul.mubr.bf16.vlgmr.msra.gmra.mxu0 %v1026_v28 }
  0x3e   :  { %868 = vmatpush3.bf16.msra.mxu1 %v1140_v3  ;;  %848 = vmatpush3.bf16.msra.mxu0 %v1140_v3 }
  0x3f   :  { %214 = vmatprep.mubr.bf16.mxu0 %v1104_v1  ;;  %849 = vmatprep.subr.bf16.mxu0 %v1102_v0 }
  0x40   :  { %869 = vmatprep.subr.bf16.mxu1 %v1102_v0  ;;  %883 = vmatprep.mubr.msk.bf16.mxu1 %vm1103_vm0, %v1102_v0 }
  0x42   :  { %870 = vmatpush3.bf16.msra.mxu1 %v1144_v6  ;;  %850 = vmatpush3.bf16.msra.mxu0 %v1144_v6 }
  0x43   :  { %871 = vmatprep.subr.bf16.mxu1 %v1102_v0  ;;  %851 = vmatprep.subr.bf16.mxu0 %v1102_v0 }
  0x45   :  { %215 = vmatmul.mubr.bf16.gmra.mxu0 %v1027_v29 }
  0x46   :  { %872 = vmatpush3.bf16.msra.mxu1 %v1147_v9  ;;  %852 = vmatpush3.bf16.msra.mxu0 %v1147_v9 }
  0x47   :  { %222 = vmatprep.mubr.bf16.mxu0 %v1104_v1  ;;  %853 = vmatprep.subr.bf16.mxu0 %v1102_v0 }
  0x48   :  { %873 = vmatprep.subr.bf16.mxu1 %v1102_v0 }
  0x4a   :  { %874 = vmatpush3.bf16.msra.mxu1 %v1151_v12  ;;  %854 = vmatpush3.bf16.msra.mxu0 %v1151_v12 }
  0x4b   :  { %875 = vmatprep.subr.bf16.mxu1 %v1102_v0  ;;  %855 = vmatprep.subr.bf16.mxu0 %v1102_v0 }
  0x4d   :  { %223 = vmatmul.mubr.bf16.gmra.mxu0 %v1028_v30  ;;  %v1033_v30 = vld [vmem:[#allocation4 + $0x44] ss:$8 sps:$4 sm:$0xff]  }
  0x4e   :  { %876 = vmatpush3.bf16.msra.mxu1 %v1155_v15  ;;  %856 = vmatpush3.bf16.msra.mxu0 %v1155_v15 }
  0x4f   :  { %230 = vmatprep.mubr.bf16.mxu0 %v1104_v1  ;;  %857 = vmatprep.subr.bf16.mxu0 %v1102_v0 }
  0x50   :  { %877 = vmatprep.subr.bf16.mxu1 %v1102_v0 }
  0x52   :  { %878 = vmatpush3.bf16.msra.mxu1 %v1158_v18  ;;  %858 = vmatpush3.bf16.msra.mxu0 %v1158_v18 }
  0x53   :  { %879 = vmatprep.subr.bf16.mxu1 %v1102_v0  ;;  %859 = vmatprep.subr.bf16.mxu0 %v1102_v0 }
  0x55   :  { %231 = vmatmul.mubr.bf16.gmra.mxu0 %v1029_v31  ;;  %v1034_v31 = vld [vmem:[#allocation4 + $0x34] ss:$8 sps:$4 sm:$0xff]  }
  0x56   :  { %880 = vmatpush3.bf16.msra.mxu1 %v1162_v21  ;;  %860 = vmatpush3.bf16.msra.mxu0 %v1162_v21 }
  0x57   :  { %881 = vmatprep.subr.bf16.mxu1 %v1102_v0  ;;  %861 = vmatprep.subr.bf16.mxu0 %v1102_v0 }
  0x58   :  { %863 = vmatprep.mubr.msk.bf16.mxu0 %vm1103_vm0, %v1102_v0 }
  0x5a   :  { %882 = vmatpush3.bf16.msra.mxu1 %v1166_v24  ;;  %862 = vmatpush3.bf16.msra.mxu0 %v1166_v24 }
  0x5b   :  { %907 = vmatprep.subr.bf16.mxu1 %v1102_v0  ;;  %887 = vmatprep.subr.bf16.mxu0 %v1102_v0 }
  0xfd   :  { %v355_v32 = vpop.f32.mrf.mxu1  ;;  %v208_v33 = vpop.f32.mrf.mxu0 }
  0xfe   :  { %v361_v34 = vadd.f32 %v355_v32, %v208_v33  ;;  %v1035_v32 = vld [vmem:[#allocation4 + $0x24] ss:$8 sps:$4 sm:$0xff]   ;;  %v1036_v33 = vld [vmem:[#allocation4 + $0x14] ss:$8 sps:$4 sm:$0xff]  }
  0xff   :  { %v845_v35 = vpop.f32.mrf.mxu1  ;;  %v210_v36 = vpop.f32.mrf.mxu0 }
 0x100   :  { %1038 = vtanh.f32 %v361_v34  ;;  %v1037_v34 = vld [vmem:[#allocation4 + $0x4] ss:$8 sps:$4 sm:$0xff]  }
 0x101   :  { %v358_v37 = vpop.f32.mrf.mxu1  ;;  %v211_v38 = vpop.f32.mrf.mxu0 }
 0x103   :  { %v846_v39 = vpop.f32.mrf.mxu1  ;;  %v213_v40 = vpop.f32.mrf.mxu0 }
 0x105   :  { %v216_v41 = vpop.f32.mrf.mxu0 }
 0x107   :  { %v218_v42 = vpop.f32.mrf.mxu0 }
 0x109   :  { %v1227_v43 = vpop.f32.mrf.mxu0 }
 0x10b   :  { %v221_v44 = vpop.f32.mrf.mxu0 }
 0x10d   :  { %v1039_v45 = vpop.eup %1038  ;;  %v1229_v46 = vpop.f32.mrf.mxu0 }
 0x10e   :  { %v363_v47 = vpack.c.bf16 %v1039_v45, %v1039_v45 }
 0x10f   :  { %v226_v48 = vpop.f32.mrf.mxu0 }
 0x110   :  { %864 = vmatmul.mubr.bf16.vlgmr.msra.gmra.mxu0 %v363_v47 }
 0x111   :  { %v1231_v49 = vpop.f32.mrf.mxu0  ;;  %888 = vmatpush3.bf16.msra.mxu0 %v1140_v3  ;;  %903 = vmatprep.mubr.msk.bf16.mxu0 %vm1103_vm0, %v1102_v0 }
 0x112   :  { %889 = vmatprep.subr.bf16.mxu0 %v1102_v0 }
 0x113   :  { %v229_v50 = vpop.f32.mrf.mxu0 }
 0x115   :  { %890 = vmatpush3.bf16.msra.mxu0 %v1144_v6  ;;  %v1251_v51 = vpop.f32.mrf.mxu0 }
 0x116   :  { %891 = vmatprep.subr.bf16.mxu0 %v1102_v0 }
 0x117   :  { %v234_v52 = vpop.f32.mrf.mxu0 }
 0x119   :  { %892 = vmatpush3.bf16.msra.mxu0 %v1147_v9  ;;  %v235_v53 = vpop.f32.mrf.mxu0 }
 0x11a   :  { %893 = vmatprep.subr.bf16.mxu0 %v1102_v0 }
 0x11b   :  { %v1253_v54 = vpop.f32.mrf.mxu0 }
 0x11d   :  { %894 = vmatpush3.bf16.msra.mxu0 %v1151_v12 }
 0x11e   :  { %895 = vmatprep.subr.bf16.mxu0 %v1102_v0 }
 0x121   :  { %896 = vmatpush3.bf16.msra.mxu0 %v1155_v15 }
 0x122   :  { %897 = vmatprep.subr.bf16.mxu0 %v1102_v0 }
 0x125   :  { %898 = vmatpush3.bf16.msra.mxu0 %v1158_v18 }
 0x126   :  { %899 = vmatprep.subr.bf16.mxu0 %v1102_v0 }
 0x129   :  { %900 = vmatpush3.bf16.msra.mxu0 %v1162_v21 }
 0x12a   :  { %901 = vmatprep.subr.bf16.mxu0 %v1102_v0 }
 0x12d   :  { %902 = vmatpush3.bf16.msra.mxu0 %v1166_v24 }
 0x12e   :  { %927 = vmatprep.subr.bf16.mxu0 %v1102_v0 }
 0x1d0   :  { %v398_v55 = vpop.f32.mrf.mxu0 }
 0x1d1   :  { %v404_v56 = vadd.f32 %v398_v55, %v211_v38 }
 0x1d2   :  { %v865_v57 = vpop.f32.mrf.mxu0 }
 0x1d3   :  { %1040 = vtanh.f32 %v404_v56 }
 0x1d4   :  { %v401_v58 = vpop.f32.mrf.mxu0 }
 0x1d6   :  { %v866_v59 = vpop.f32.mrf.mxu0 }
 0x1e0   :  { %v1041_v60 = vpop.eup %1040 }
 0x1e1   :  { %v406_v61 = vpack.c.bf16 %v1041_v60, %v1041_v60 }
 0x1e3   :  { %884 = vmatmul.mubr.bf16.vlgmr.msra.gmra.mxu1 %v406_v61 }
 0x1e4   :  { %908 = vmatpush3.bf16.msra.mxu1 %v1140_v3  ;;  %923 = vmatprep.mubr.msk.bf16.mxu1 %vm1103_vm0, %v1102_v0 }
 0x1e5   :  { %909 = vmatprep.subr.bf16.mxu1 %v1102_v0 }
 0x1e8   :  { %910 = vmatpush3.bf16.msra.mxu1 %v1144_v6 }
 0x1e9   :  { %911 = vmatprep.subr.bf16.mxu1 %v1102_v0 }
 0x1ec   :  { %912 = vmatpush3.bf16.msra.mxu1 %v1147_v9 }
 0x1ed   :  { %913 = vmatprep.subr.bf16.mxu1 %v1102_v0 }
 0x1f0   :  { %914 = vmatpush3.bf16.msra.mxu1 %v1151_v12 }
 0x1f1   :  { %915 = vmatprep.subr.bf16.mxu1 %v1102_v0 }
 0x1f4   :  { %916 = vmatpush3.bf16.msra.mxu1 %v1155_v15 }
 0x1f5   :  { %917 = vmatprep.subr.bf16.mxu1 %v1102_v0 }
 0x1f8   :  { %918 = vmatpush3.bf16.msra.mxu1 %v1158_v18 }
 0x1f9   :  { %919 = vmatprep.subr.bf16.mxu1 %v1102_v0 }
 0x1fc   :  { %920 = vmatpush3.bf16.msra.mxu1 %v1162_v21 }
 0x1fd   :  { %921 = vmatprep.subr.bf16.mxu1 %v1102_v0 }
 0x200   :  { %922 = vmatpush3.bf16.msra.mxu1 %v1166_v24 }
 0x201   :  { %947 = vmatprep.subr.bf16.mxu1 %v1102_v0 }
 0x2a3   :  { %v441_v62 = vpop.f32.mrf.mxu1 }
 0x2a4   :  { %v447_v63 = vadd.f32 %v441_v62, %v216_v41 }
 0x2a5   :  { %v885_v1 = vpop.f32.mrf.mxu1 }
 0x2a6   :  { %1042 = vtanh.f32 %v447_v63 }
 0x2a7   :  { %v444_v2 = vpop.f32.mrf.mxu1 }
 0x2a9   :  { %v886_v4 = vpop.f32.mrf.mxu1 }
 0x2b3   :  { %v1043_v5 = vpop.eup %1042 }
 0x2b4   :  { %v449_v7 = vpack.c.bf16 %v1043_v5, %v1043_v5 }
 0x2b6   :  { %904 = vmatmul.mubr.bf16.vlgmr.msra.gmra.mxu0 %v449_v7 }
 0x2b7   :  { %928 = vmatpush3.bf16.msra.mxu0 %v1140_v3  ;;  %943 = vmatprep.mubr.msk.bf16.mxu0 %vm1103_vm0, %v1102_v0 }
 0x2b8   :  { %929 = vmatprep.subr.bf16.mxu0 %v1102_v0 }
 0x2bb   :  { %930 = vmatpush3.bf16.msra.mxu0 %v1144_v6 }
 0x2bc   :  { %931 = vmatprep.subr.bf16.mxu0 %v1102_v0 }
 0x2bf   :  { %932 = vmatpush3.bf16.msra.mxu0 %v1147_v9 }
 0x2c0   :  { %933 = vmatprep.subr.bf16.mxu0 %v1102_v0 }
 0x2c3   :  { %934 = vmatpush3.bf16.msra.mxu0 %v1151_v12 }
 0x2c4   :  { %935 = vmatprep.subr.bf16.mxu0 %v1102_v0 }
 0x2c7   :  { %936 = vmatpush3.bf16.msra.mxu0 %v1155_v15 }
 0x2c8   :  { %937 = vmatprep.subr.bf16.mxu0 %v1102_v0 }
 0x2cb   :  { %938 = vmatpush3.bf16.msra.mxu0 %v1158_v18 }
 0x2cc   :  { %939 = vmatprep.subr.bf16.mxu0 %v1102_v0 }
 0x2cf   :  { %940 = vmatpush3.bf16.msra.mxu0 %v1162_v21 }
 0x2d0   :  { %941 = vmatprep.subr.bf16.mxu0 %v1102_v0 }
 0x2d3   :  { %942 = vmatpush3.bf16.msra.mxu0 %v1166_v24 }
 0x2d4   :  { %967 = vmatprep.subr.bf16.mxu0 %v1102_v0 }
 0x376   :  { %v484_v8 = vpop.f32.mrf.mxu0 }
 0x377   :  { %v490_v10 = vadd.f32 %v484_v8, %v1227_v43 }
 0x378   :  { %v905_v11 = vpop.f32.mrf.mxu0 }
 0x379   :  { %1044 = vtanh.f32 %v490_v10 }
 0x37a   :  { %v487_v13 = vpop.f32.mrf.mxu0 }
 0x37c   :  { %v906_v14 = vpop.f32.mrf.mxu0 }
 0x386   :  { %v1045_v16 = vpop.eup %1044 }
 0x387   :  { %v492_v17 = vpack.c.bf16 %v1045_v16, %v1045_v16 }
 0x389   :  { %924 = vmatmul.mubr.bf16.vlgmr.msra.gmra.mxu1 %v492_v17 }
 0x38a   :  { %948 = vmatpush3.bf16.msra.mxu1 %v1140_v3  ;;  %963 = vmatprep.mubr.msk.bf16.mxu1 %vm1103_vm0, %v1102_v0 }
 0x38b   :  { %949 = vmatprep.subr.bf16.mxu1 %v1102_v0 }
 0x38e   :  { %950 = vmatpush3.bf16.msra.mxu1 %v1144_v6 }
 0x38f   :  { %951 = vmatprep.subr.bf16.mxu1 %v1102_v0 }
 0x392   :  { %952 = vmatpush3.bf16.msra.mxu1 %v1147_v9 }
 0x393   :  { %953 = vmatprep.subr.bf16.mxu1 %v1102_v0 }
 0x396   :  { %954 = vmatpush3.bf16.msra.mxu1 %v1151_v12 }
 0x397   :  { %955 = vmatprep.subr.bf16.mxu1 %v1102_v0 }
 0x39a   :  { %956 = vmatpush3.bf16.msra.mxu1 %v1155_v15 }
 0x39b   :  { %957 = vmatprep.subr.bf16.mxu1 %v1102_v0 }
 0x39e   :  { %958 = vmatpush3.bf16.msra.mxu1 %v1158_v18  ;;  %v1030_v18 = vld [vmem:[#allocation4 + $0x74] ss:$8 sps:$4 sm:$0xff]  }
 0x39f   :  { %959 = vmatprep.subr.bf16.mxu1 %v1102_v0 }
 0x3a2   :  { %960 = vmatpush3.bf16.msra.mxu1 %v1162_v21  ;;  %v1031_v21 = vld [vmem:[#allocation4 + $0x64] ss:$8 sps:$4 sm:$0xff]  }
 0x3a3   :  { %961 = vmatprep.subr.bf16.mxu1 %v1102_v0 }
 0x3a6   :  { %962 = vmatpush3.bf16.msra.mxu1 %v1166_v24 }
 0x449   :  { %v527_v3 = vpop.f32.mrf.mxu1 }
 0x44a   :  { %v533_v6 = vadd.f32 %v527_v3, %v1229_v46 }
 0x44b   :  { %v925_v9 = vpop.f32.mrf.mxu1 }
 0x44c   :  { %1046 = vtanh.f32 %v533_v6 }
 0x44d   :  { %v530_v12 = vpop.f32.mrf.mxu1 }
 0x44f   :  { %v926_v19 = vpop.f32.mrf.mxu1 }
 0x459   :  { %v1047_v15 = vpop.eup %1046 }
 0x45a   :  { %v535_v20 = vpack.c.bf16 %v1047_v15, %v1047_v15 }
 0x45c   :  { %944 = vmatmul.mubr.bf16.vlgmr.msra.gmra.mxu0 %v535_v20 }
 0x45d   :  { %983 = vmatprep.mubr.msk.bf16.mxu0 %vm1103_vm0, %v1102_v0  ;;  %968 = vmatpush3.bf16.msra.mxu0 %v1030_v18 }
 0x45e   :  { %969 = vmatprep.subr.bf16.mxu0 %v1102_v0 }
 0x461   :  { %970 = vmatpush3.bf16.msra.mxu0 %v1031_v21 }
 0x462   :  { %971 = vmatprep.subr.bf16.mxu0 %v1102_v0 }
 0x465   :  { %972 = vmatpush3.bf16.msra.mxu0 %v1032_v22 }
 0x466   :  { %973 = vmatprep.subr.bf16.mxu0 %v1102_v0 }
 0x469   :  { %974 = vmatpush3.bf16.msra.mxu0 %v1033_v30 }
 0x46a   :  { %975 = vmatprep.subr.bf16.mxu0 %v1102_v0 }
 0x46d   :  { %976 = vmatpush3.bf16.msra.mxu0 %v1034_v31 }
 0x46e   :  { %977 = vmatprep.subr.bf16.mxu0 %v1102_v0 }
 0x471   :  { %978 = vmatpush3.bf16.msra.mxu0 %v1035_v32 }
 0x472   :  { %979 = vmatprep.subr.bf16.mxu0 %v1102_v0 }
 0x475   :  { %980 = vmatpush3.bf16.msra.mxu0 %v1036_v33 }
 0x476   :  { %981 = vmatprep.subr.bf16.mxu0 %v1102_v0 }
 0x479   :  { %982 = vmatpush3.bf16.msra.mxu0 %v1037_v34 }
 0x51c   :  { %v570_v23 = vpop.f32.mrf.mxu0 }
 0x51d   :  { %v576_v24 = vadd.f32 %v570_v23, %v1231_v49 }
 0x51e   :  { %v945_v25 = vpop.f32.mrf.mxu0 }
 0x51f   :  { %1048 = vtanh.f32 %v576_v24 }
 0x520   :  { %v573_v26 = vpop.f32.mrf.mxu0 }
 0x522   :  { %v946_v27 = vpop.f32.mrf.mxu0 }
 0x52c   :  { %v1049_v28 = vpop.eup %1048 }
 0x52d   :  { %v578_v29 = vpack.c.bf16 %v1049_v28, %v1049_v28 }
 0x52f   :  { %964 = vmatmul.mubr.bf16.vlgmr.msra.gmra.mxu1 %v578_v29 }
 0x5ef   :  { %v613_v35 = vpop.f32.mrf.mxu1 }
 0x5f0   :  { %v619_v36 = vadd.f32 %v613_v35, %v1251_v51 }
 0x5f1   :  { %v965_v37 = vpop.f32.mrf.mxu1 }
 0x5f2   :  { %1050 = vtanh.f32 %v619_v36 }
 0x5f3   :  { %v616_v38 = vpop.f32.mrf.mxu1 }
 0x5f5   :  { %v966_v39 = vpop.f32.mrf.mxu1 }
 0x5ff   :  { %v1051_v40 = vpop.eup %1050 }
 0x600   :  { %v621_v41 = vpack.c.bf16 %v1051_v40, %v1051_v40 }
 0x602   :  { %984 = vmatmul.mubr.bf16.vlgmr.msra.gmra.mxu0 %v621_v41 }
 0x6c2   :  { %v704_v42 = vpop.f32.mrf.mxu0 }
 0x6c3   :  { %v710_v43 = vadd.f32 %v704_v42, %v1253_v54 }
 0x6c4   :  { %v985_v44 = vpop.f32.mrf.mxu0 }
 0x6c5   :  { %1052 = vtanh.f32 %v710_v43 }
 0x6c6   :  { %v707_v45 = vpop.f32.mrf.mxu0 }
 0x6c8   :  { %v986_v46 = vpop.f32.mrf.mxu0 }
 0x6d2   :  { %v1053_v0 = vpop.eup %1052 }
 0x6d3   :  { %712 = vst [vmem:[%s1329_s4] sm:$0xff] %v1053_v0 }
 0x6d4   :  { %717 = vsyncpa [#allocation3], 1 }
 0x6d5   :  { %718 = vsyncpa [#allocation5], 1 }

</bundles_post_ra>
